<compile_context>
chip_gen: v7x
topology: tpu7x:2x2x1
jax: 0.10.0
libtpu: 0.0.40
codegen_flags: <defaults>
</compile_context>

<pallas_src>
import functools

import jax
import jax.numpy as jnp
from jax.experimental import pallas as pl
from jax.experimental.pallas import tpu as pltpu

LOGIT_DIM = 14
FEAT_DIM = 512
LANE = 128
SUBLANE = 8


def resnet_2fc_kernel(x_ref, wf_ref, bf_ref, w2_ref, b2_ref,
                      logits_ref, lid_ref, *, inv_hw):
    # x_ref: (TILE_N, C, HW_pad)  (spatial zero-padded -> sum is exact)
    x = x_ref[...].astype(jnp.float32)
    # Global average pool over the true spatial extent (ResNet avgpool).
    pooled = jnp.sum(x, axis=-1) * inv_hw                      # (TILE_N, C)
    # Backbone head: Linear(C -> 512) + ReLU -> lid_feature.
    feat = jnp.dot(pooled, wf_ref[...],
                   preferred_element_type=jnp.float32) + bf_ref[...]
    feat = jnp.maximum(feat, 0.0)
    lid_ref[...] = feat
    # fc_layer_2: Linear(512 -> 14), output padded to 128 lanes.
    logits_ref[...] = jnp.dot(feat, w2_ref[...],
                              preferred_element_type=jnp.float32) + b2_ref[...]


def _round_up(v, m):
    return ((v + m - 1) // m) * m


def resnet_2fc_forward(x, wf, bf, w2, b2, *, tile_n=128):
    """x: (N, C, H, W).  Returns (logits (N,14) f32, lid_feature (N,512) f32)."""
    N, C, H, W = x.shape
    HW = H * W
    HW_pad = _round_up(HW, LANE)
    itemsize = jnp.dtype(x.dtype).itemsize

    # --- choose batch tile so double-buffered x tiles stay within a v7x-safe budget
    x_budget = 24 * 1024 * 1024                      # bytes for 2 x-tile buffers
    bytes_per_row = C * HW_pad * itemsize
    max_tile = max(SUBLANE, (x_budget // (2 * bytes_per_row)) // SUBLANE * SUBLANE)
    tile_n = int(min(tile_n, max_tile))
    tile_n = max(SUBLANE, min(tile_n, _round_up(N, SUBLANE)))
    N_pad = _round_up(N, tile_n)
    grid = (N_pad // tile_n,)

    # --- wrapper-side layout prep (padding only; no compute hoisted)
    x2 = x.reshape(N, C, HW)
    x2 = jnp.pad(x2, ((0, N_pad - N), (0, 0), (0, HW_pad - HW)))
    bf2 = bf.reshape(1, FEAT_DIM).astype(jnp.float32)
    w2p = jnp.pad(w2.astype(jnp.float32), ((0, 0), (0, LANE - LOGIT_DIM)))
    b2p = jnp.pad(b2.reshape(1, LOGIT_DIM).astype(jnp.float32),
                  ((0, 0), (0, LANE - LOGIT_DIM)))
    wf2 = wf.astype(jnp.float32)

    # --- VMEM budget estimate -> explicit scoped-VMEM limit (conservative for v7x)
    x_bytes = 2 * tile_n * C * HW_pad * itemsize
    w_bytes = 2 * 4 * (C * FEAT_DIM + FEAT_DIM + FEAT_DIM * LANE + LANE)
    o_bytes = 2 * 4 * tile_n * (FEAT_DIM + LANE)
    vmem_limit = int(min(60 * 1024 * 1024,
                         max(32 * 1024 * 1024,
                             1.5 * (x_bytes + w_bytes + o_bytes))))

    kernel = functools.partial(resnet_2fc_kernel, inv_hw=1.0 / float(HW))

    logits_pad, lid_feature_pad = pl.pallas_call(
        kernel,
        grid=grid,
        out_shape=(
            jax.ShapeDtypeStruct((N_pad, LANE), jnp.float32),      # padded logits
            jax.ShapeDtypeStruct((N_pad, FEAT_DIM), jnp.float32),  # lid_feature
        ),
        in_specs=[
            # streamed activations: one batch tile per grid step
            pl.BlockSpec((tile_n, C, HW_pad), lambda i: (i, 0, 0)),
            # grid-invariant (VMEM-resident) weights / biases
            pl.BlockSpec((C, FEAT_DIM), lambda i: (0, 0)),
            pl.BlockSpec((1, FEAT_DIM), lambda i: (0, 0)),
            pl.BlockSpec((FEAT_DIM, LANE), lambda i: (0, 0)),
            pl.BlockSpec((1, LANE), lambda i: (0, 0)),
        ],
        out_specs=(
            pl.BlockSpec((tile_n, LANE), lambda i: (i, 0)),
            pl.BlockSpec((tile_n, FEAT_DIM), lambda i: (i, 0)),
        ),
        compiler_params=pltpu.CompilerParams(
            dimension_semantics=("parallel",),
            vmem_limit_bytes=vmem_limit,
        ),
    )(x2, wf2, bf2, w2p, b2p)

    logits = logits_pad[:N, :LOGIT_DIM]
    lid_feature = lid_feature_pad[:N]
    return logits, lid_feature


def init_params(key, c_in):
    """Deterministic PyTorch-nn.Linear-style uniform init."""
    k1, k2, k3, k4 = jax.random.split(key, 4)
    # backbone head: Linear(c_in, 512)
    bound_f = 1.0 / jnp.sqrt(c_in)
    wf = jax.random.uniform(k1, (c_in, FEAT_DIM), jnp.float32, -bound_f, bound_f)
    bf = jax.random.uniform(k2, (FEAT_DIM,), jnp.float32, -bound_f, bound_f)
    # fc_layer_2: Linear(512, 14)  (stored as (in, out) = W^T of PyTorch)
    bound_2 = 1.0 / jnp.sqrt(float(FEAT_DIM))
    w2 = jax.random.uniform(k3, (FEAT_DIM, LOGIT_DIM), jnp.float32, -bound_2, bound_2)
    b2 = jax.random.uniform(k4, (LOGIT_DIM,), jnp.float32, -bound_2, bound_2)
    return wf, bf, w2, b2


if __name__ == "__main__":
    key = jax.random.PRNGKey(0)
    kx, kp = jax.random.split(key)

    N, C, H, W = 2, 4, 16, 16
    x = jax.random.normal(kx, (N, C, H, W), dtype=jnp.float32)
    wf, bf, w2, b2 = init_params(kp, C)

    logits, lid_feature = jax.jit(resnet_2fc_forward)(x, wf, bf, w2, b2)
    jax.block_until_ready((logits, lid_feature))

    # Pure-JAX reference check
    pooled_ref = jnp.mean(x.reshape(N, C, H * W), axis=-1)
    feat_ref = jnp.maximum(pooled_ref @ wf + bf, 0.0)
    logits_ref = feat_ref @ w2 + b2
    assert jnp.allclose(lid_feature, feat_ref, atol=1e-5), "lid_feature mismatch"
    assert jnp.allclose(logits, logits_ref, atol=1e-5), "logits mismatch"
    assert logits.shape == (N, LOGIT_DIM) and lid_feature.shape == (N, FEAT_DIM)

    print("KERNEL_OK")
</pallas_src>

<mosaic_0001>
module attributes {stable_mosaic.version = 11 : i64} {
  func.func @resnet_2fc_kernel(%arg0: i32, %arg1: memref<8x4x256xf32, #tpu.memory_space<vmem>>, %arg2: memref<4x512xf32, #tpu.memory_space<vmem>>, %arg3: memref<1x512xf32, #tpu.memory_space<vmem>>, %arg4: memref<512x128xf32, #tpu.memory_space<vmem>>, %arg5: memref<1x128xf32, #tpu.memory_space<vmem>>, %arg6: memref<8x128xf32, #tpu.memory_space<vmem>>, %arg7: memref<8x512xf32, #tpu.memory_space<vmem>>) attributes {dimension_semantics = [#tpu.dimension_semantics<parallel>], iteration_bounds = array<i64: 1>, scalar_prefetch = 0 : i64, scratch_operands = 0 : i64, tpu.core_type = #tpu.core_type<tc>, window_params = [{transform_indices = @transform_0, window_bounds = array<i64: 8, 4, 256>}, {pipeline_mode = #tpu.pipeline_mode<synchronous>, transform_indices = @transform_1, window_bounds = array<i64: 4, 512>}, {pipeline_mode = #tpu.pipeline_mode<synchronous>, transform_indices = @transform_2, window_bounds = array<i64: 1, 512>}, {pipeline_mode = #tpu.pipeline_mode<synchronous>, transform_indices = @transform_3, window_bounds = array<i64: 512, 128>}, {pipeline_mode = #tpu.pipeline_mode<synchronous>, transform_indices = @transform_4, window_bounds = array<i64: 1, 128>}, {transform_indices = @transform_5, window_bounds = array<i64: 8, 128>}, {transform_indices = @transform_6, window_bounds = array<i64: 8, 512>}]} {
    %c0 = arith.constant 0 : index
    %c0_0 = arith.constant 0 : index
    %c0_1 = arith.constant 0 : index
    %0 = vector.load %arg1[%c0, %c0_0, %c0_1] : memref<8x4x256xf32, #tpu.memory_space<vmem>>, vector<8x4x256xf32>
    %cst = arith.constant dense<0.000000e+00> : vector<8x4xf32>
    %1 = vector.multi_reduction <add>, %0, %cst [2] : vector<8x4x256xf32> to vector<8x4xf32>
    %cst_2 = arith.constant 3.906250e-03 : f32
    %2 = vector.broadcast %cst_2 : f32 to vector<8x4xf32>
    %3 = arith.mulf %1, %2 : vector<8x4xf32>
    %c0_3 = arith.constant 0 : index
    %c0_4 = arith.constant 0 : index
    %4 = vector.load %arg2[%c0_3, %c0_4] : memref<4x512xf32, #tpu.memory_space<vmem>>, vector<4x512xf32>
    %cst_5 = arith.constant dense<0.000000e+00> : vector<8x512xf32>
    %5 = tpu.matmul %3, %4, %cst_5 {dimension_numbers = #tpu.dot_dimension_numbers<[1], [0], [0], [1], [0, 0, 1, 1], [], []>} : vector<8x4xf32>, vector<4x512xf32>, vector<8x512xf32> -> vector<8x512xf32>
    %c0_6 = arith.constant 0 : index
    %c0_7 = arith.constant 0 : index
    %6 = vector.load %arg3[%c0_6, %c0_7] : memref<1x512xf32, #tpu.memory_space<vmem>>, vector<1x512xf32>
    %7 = vector.broadcast %6 : vector<1x512xf32> to vector<8x512xf32>
    %8 = arith.addf %5, %7 : vector<8x512xf32>
    %cst_8 = arith.constant 0.000000e+00 : f32
    %9 = vector.broadcast %cst_8 : f32 to vector<8x512xf32>
    %10 = arith.maximumf %8, %9 : vector<8x512xf32>
    %c0_9 = arith.constant 0 : index
    %c0_10 = arith.constant 0 : index
    %11 = vector.load %arg7[%c0_9, %c0_10] : memref<8x512xf32, #tpu.memory_space<vmem>>, vector<8x512xf32>
    tpu.vector_store %arg7[%c0_9, %c0_10], %10 {strides = array<i32>} : memref<8x512xf32, #tpu.memory_space<vmem>>, vector<8x512xf32>,
    %c0_11 = arith.constant 0 : index
    %c0_12 = arith.constant 0 : index
    %12 = vector.load %arg4[%c0_11, %c0_12] : memref<512x128xf32, #tpu.memory_space<vmem>>, vector<512x128xf32>
    %cst_13 = arith.constant dense<0.000000e+00> : vector<8x128xf32>
    %13 = tpu.matmul %10, %12, %cst_13 {dimension_numbers = #tpu.dot_dimension_numbers<[1], [0], [0], [1], [0, 0, 1, 1], [], []>} : vector<8x512xf32>, vector<512x128xf32>, vector<8x128xf32> -> vector<8x128xf32>
    %c0_14 = arith.constant 0 : index
    %c0_15 = arith.constant 0 : index
    %14 = vector.load %arg5[%c0_14, %c0_15] : memref<1x128xf32, #tpu.memory_space<vmem>>, vector<1x128xf32>
    %15 = vector.broadcast %14 : vector<1x128xf32> to vector<8x128xf32>
    %16 = arith.addf %13, %15 : vector<8x128xf32>
    %c0_16 = arith.constant 0 : index
    %c0_17 = arith.constant 0 : index
    %17 = vector.load %arg6[%c0_16, %c0_17] : memref<8x128xf32, #tpu.memory_space<vmem>>, vector<8x128xf32>
    tpu.vector_store %arg6[%c0_16, %c0_17], %16 {strides = array<i32>} : memref<8x128xf32, #tpu.memory_space<vmem>>, vector<8x128xf32>,
    return
  }
  func.func @transform_0(%arg0: i32) -> (i32, i32, i32) {
    %c0_i32 = arith.constant 0 : i32
    %c0_i32_0 = arith.constant 0 : i32
    %c0_i32_1 = arith.constant 0 : i32
    return %arg0, %c0_i32, %c0_i32_0 : i32, i32, i32
  }
  func.func @transform_1(%arg0: i32) -> (i32, i32) {
    %c0_i32 = arith.constant 0 : i32
    %c0_i32_0 = arith.constant 0 : i32
    %c0_i32_1 = arith.constant 0 : i32
    return %c0_i32, %c0_i32_0 : i32, i32
  }
  func.func @transform_2(%arg0: i32) -> (i32, i32) {
    %c0_i32 = arith.constant 0 : i32
    %c0_i32_0 = arith.constant 0 : i32
    %c0_i32_1 = arith.constant 0 : i32
    return %c0_i32, %c0_i32_0 : i32, i32
  }
  func.func @transform_3(%arg0: i32) -> (i32, i32) {
    %c0_i32 = arith.constant 0 : i32
    %c0_i32_0 = arith.constant 0 : i32
    %c0_i32_1 = arith.constant 0 : i32
    return %c0_i32, %c0_i32_0 : i32, i32
  }
  func.func @transform_4(%arg0: i32) -> (i32, i32) {
    %c0_i32 = arith.constant 0 : i32
    %c0_i32_0 = arith.constant 0 : i32
    %c0_i32_1 = arith.constant 0 : i32
    return %c0_i32, %c0_i32_0 : i32, i32
  }
  func.func @transform_5(%arg0: i32) -> (i32, i32) {
    %c0_i32 = arith.constant 0 : i32
    %c0_i32_0 = arith.constant 0 : i32
    return %arg0, %c0_i32 : i32, i32
  }
  func.func @transform_6(%arg0: i32) -> (i32, i32) {
    %c0_i32 = arith.constant 0 : i32
    %c0_i32_0 = arith.constant 0 : i32
    return %arg0, %c0_i32 : i32, i32
  }
}

</mosaic_0001>

<bundles_post_ra>
// kernel: resnet_2fc_forward.1
= control target key start
LH: loop header
LB: loop body
LE: loop exit
PB: predicated region body
PF: predicated region fallthrough
CT: control target
= control target key end

     0   :  { %vm54_vm0 = vcmask 1043456   ;;  %v720_v44 = vmov 0.0   ;;  %v107_v51 = vlaneseq  ;;  %vm169_vm1 = vcmask 1041409   ;;  %s1028_s0 = inlined_call_operand.vmem [shape: f32[8,4,256], index: 0, kind: input, shape index: {}]   ;;  %s1029_s1 = inlined_call_operand.vmem [shape: f32[4,512], index: 1, kind: input, shape index: {}]   ;;  %s1030_s3 = inlined_call_operand.vmem [shape: f32[512,128], index: 3, kind: input, shape index: {}]   ;;  %s1031_s2 = inlined_call_operand.vmem [shape: f32[1,512], index: 2, kind: input, shape index: {}]   ;;  %s1032_s6 = inlined_call_operand.vmem [shape: f32[8,512], index: 6, kind: output, shape index: {1}]   ;;  %s1033_s4 = inlined_call_operand.vmem [shape: f32[1,128], index: 4, kind: input, shape index: {}]   ;;  %s1034_s5 = inlined_call_operand.vmem [shape: f32[8,128], index: 5, kind: output, shape index: {0}]  }
   0x1   :  { %v22_v0 = vld [vmem:[%s1028_s0] sm:$0xff]  ;;  %v24_v1 = vld [vmem:[%s1028_s0 + $0x10] sm:$0xff]  ;;  %v23_v2 = vld [vmem:[%s1028_s0 + $0x8] sm:$0xff]  ;;  %262 = vmatprep.mubr.f32.mxu0 %v720_v44  ;;  %333 = vmatprep.mubr.f32.mxu1 %v720_v44  ;;  %vm171_vm2 = vcmask 1042434   ;;  %vm173_vm3 = vcmask 1043459   ;;  %vm175_vm4 = vcmask 1044484  }
   0x2   :  { %v38_v3 = vcombine.high %v22_v0, %v22_v0  ;;  %v55_v4 = vsel %vm54_vm0, %v22_v0, 0.0  ;;  %v40_v5 = vcombine.high %v24_v1, %v24_v1  ;;  %v65_v6 = vsel %vm54_vm0, %v24_v1, 0.0  ;;  %v25_v7 = vld [vmem:[%s1028_s0 + $0x18] sm:$0xff]  ;;  %v26_v8 = vld [vmem:[%s1028_s0 + $0x20] sm:$0xff]  ;;  %v27_v12 = vld [vmem:[%s1028_s0 + $0x28] sm:$0xff] }
   0x3   :  { %v39_v9 = vcombine.high %v23_v2, %v23_v2  ;;  %v60_v10 = vsel %vm54_vm0, %v23_v2, 0.0  ;;  %v41_v11 = vcombine.high %v25_v7, %v25_v7  ;;  %v70_v15 = vsel %vm54_vm0, %v25_v7, 0.0  ;;  %v28_v21 = vld [vmem:[%s1028_s0 + $0x30] sm:$0xff]  ;;  %v29_v22 = vld [vmem:[%s1028_s0 + $0x38] sm:$0xff]  ;;  %v103_v40 = vld [vmem:[%s1029_s1] sm:$0xff] }
   0x4   :  { %v56_v13 = vsel %vm54_vm0, %v38_v3, 0.0  ;;  %v66_v14 = vsel %vm54_vm0, %v40_v5, 0.0  ;;  %v42_v16 = vcombine.high %v26_v8, %v26_v8  ;;  %v43_v23 = vcombine.high %v27_v12, %v27_v12  ;;  %v104_v41 = vld [vmem:[%s1029_s1 + $0x8] sm:$0xff]  ;;  %v364_v45 = vld [vmem:[%s1030_s3 + $0x80] sm:$0xff] }
   0x5   :  { %v57_v17 = vadd.f32 %v56_v13, %v55_v4  ;;  %v67_v18 = vadd.f32 %v66_v14, %v65_v6  ;;  %v61_v19 = vsel %vm54_vm0, %v39_v9, 0.0  ;;  %v71_v20 = vsel %vm54_vm0, %v41_v11, 0.0  ;;  %v365_v46 = vld [vmem:[%s1030_s3 + $0x88] sm:$0xff]  ;;  %v396_v47 = vld [vmem:[%s1030_s3 + $0x180] sm:$0xff] }
   0x6   :  { %v62_v24 = vadd.f32 %v61_v19, %v60_v10  ;;  %v72_v25 = vadd.f32 %v71_v20, %v70_v15  ;;  %v75_v26 = vsel %vm54_vm0, %v26_v8, 0.0  ;;  %v76_v27 = vsel %vm54_vm0, %v42_v16, 0.0  ;;  %v397_v49 = vld [vmem:[%s1030_s3 + $0x188] sm:$0xff]  ;;  %v348_v14 = vld [vmem:[%s1030_s3] sm:$0xff] }
   0x7   :  { %58 = vadd.xlane.f32.xlu0 %v57_v17  ;;  %68 = vadd.xlane.f32.xlu1 %v67_v18  ;;  %v80_v28 = vsel %vm54_vm0, %v27_v12, 0.0  ;;  %v81_v29 = vsel %vm54_vm0, %v43_v23, 0.0  ;;  %v44_v30 = vcombine.high %v28_v21, %v28_v21  ;;  %v45_v31 = vcombine.high %v29_v22, %v29_v22  ;;  %v349_v15 = vld [vmem:[%s1030_s3 + $0x8] sm:$0xff]  ;;  %v380_v19 = vld [vmem:[%s1030_s3 + $0x100] sm:$0xff]  ;;  %v398_v23 = vld [vmem:[%s1030_s3 + $0x190] sm:$0xff] }
   0x8   :  { %v77_v32 = vadd.f32 %v76_v27, %v75_v26  ;;  %v82_v33 = vadd.f32 %v81_v29, %v80_v28  ;;  %v85_v34 = vsel %vm54_vm0, %v28_v21, 0.0  ;;  %v90_v36 = vsel %vm54_vm0, %v29_v22, 0.0  ;;  %v381_v20 = vld [vmem:[%s1030_s3 + $0x108] sm:$0xff]  ;;  %v366_v21 = vld [vmem:[%s1030_s3 + $0x90] sm:$0xff]  ;;  %v367_v22 = vld [vmem:[%s1030_s3 + $0x98] sm:$0xff] }
   0x9   :  { %v86_v35 = vsel %vm54_vm0, %v44_v30, 0.0  ;;  %v91_v37 = vsel %vm54_vm0, %v45_v31, 0.0  ;;  %v185_v42 = vcombine.high %v103_v40, %v103_v40  ;;  %v186_v43 = vcombine.high %v104_v41, %v104_v41  ;;  %v350_v30 = vld [vmem:[%s1030_s3 + $0x10] sm:$0xff]  ;;  %v351_v31 = vld [vmem:[%s1030_s3 + $0x18] sm:$0xff]  ;;  %v352_v44 = vld [vmem:[%s1030_s3 + $0x20] sm:$0xff] }
   0xa   :  { %v87_v38 = vadd.f32 %v86_v35, %v85_v34  ;;  %v92_v39 = vadd.f32 %v91_v37, %v90_v36  ;;  %v645_v48 = vpack.c.bf16 %v365_v46, %v364_v45  ;;  %v677_v50 = vpack.c.bf16 %v397_v49, %v396_v47  ;;  %v382_v35 = vld [vmem:[%s1030_s3 + $0x110] sm:$0xff]  ;;  %v383_v36 = vld [vmem:[%s1030_s3 + $0x118] sm:$0xff]  ;;  %v368_v37 = vld [vmem:[%s1030_s3 + $0xa0] sm:$0xff] }
   0xb   :  { %63 = vadd.xlane.f32.xlu0 %v62_v24  ;;  %73 = vadd.xlane.f32.xlu1 %v72_v25  ;;  %v818_v52 = vshrl.u32 %v107_v51, 7  ;;  %v136_v53 = vand.u32 127, %v107_v51  ;;  %vm177_vm5 = vcmask 1045509   ;;  %vm179_vm6 = vcmask 1046534   ;;  %v399_v24 = vld [vmem:[%s1030_s3 + $0x198] sm:$0xff]  ;;  %v353_v45 = vld [vmem:[%s1030_s3 + $0x28] sm:$0xff] }
   0xc   :  { %568 = vmatprep.subr.msk.mxu0 %vm54_vm0, %v185_v42  ;;  %571 = vmatprep.subr.msk.mxu1 %vm54_vm0, %v186_v43  ;;  %vm181_vm7 = vcmask 1047559   ;;  %vm187_vm8 = vcmask 31744   ;;  %v647_v28 = vpack.c.bf16 %v349_v15, %v348_v14  ;;  %v679_v29 = vpack.c.bf16 %v381_v20, %v380_v19  ;;  %v385_v49 = vld [vmem:[%s1030_s3 + $0x128] sm:$0xff]  ;;  %v371_v51 = vld [vmem:[%s1030_s3 + $0xb8] sm:$0xff] }
   0xd   :  { %569 = vmatpush1.msk.msra.mxu0 %vm54_vm0, %v103_v40  ;;  %572 = vmatpush1.msk.msra.mxu1 %vm54_vm0, %v104_v41  ;;  %v139_v56 = vsub.s32 %v136_v53, %v818_v52  ;;  %v681_v34 = vpack.c.bf16 %v399_v24, %v398_v23  ;;  %v400_v40 = vld [vmem:[%s1030_s3 + $0x1a0] sm:$0xff]  ;;  %v401_v41 = vld [vmem:[%s1030_s3 + $0x1a8] sm:$0xff]  ;;  %v651_v42 = vpack.c.bf16 %v351_v31, %v350_v30  ;;  %v402_v53 = vld [vmem:[%s1030_s3 + $0x1b0] sm:$0xff] }
   0xe   :  { %646 = vmatprep.subr.bf16.mxu0 %v645_v48  ;;  %678 = vmatprep.subr.bf16.mxu1 %v677_v50  ;;  %v683_v43 = vpack.c.bf16 %v383_v36, %v382_v35  ;;  %v685_v47 = vpack.c.bf16 %v401_v41, %v400_v40  ;;  %v384_v48 = vld [vmem:[%s1030_s3 + $0x120] sm:$0xff]  ;;  %v370_v50 = vld [vmem:[%s1030_s3 + $0xb0] sm:$0xff]  ;;  %v407_v14 = vld [vmem:[%s1030_s3 + $0x1d8] sm:$0xff] }
   0xf   :  { %78 = vadd.xlane.f32.xlu0 %v77_v32  ;;  %83 = vadd.xlane.f32.xlu1 %v82_v33  ;;  %v649_v33 = vpack.c.bf16 %v367_v22, %v366_v21  ;;  %v390_v21 = vld [vmem:[%s1030_s3 + $0x150] sm:$0xff]  ;;  %v391_v22 = vld [vmem:[%s1030_s3 + $0x158] sm:$0xff]  ;;  %v376_v23 = vld [vmem:[%s1030_s3 + $0xe0] sm:$0xff] }
  0x10   :  { %v377_v24 = vld [vmem:[%s1030_s3 + $0xe8] sm:$0xff]  ;;  %v360_v31 = vld [vmem:[%s1030_s3 + $0x60] sm:$0xff]  ;;  %v411_v41 = vld [vmem:[%s1030_s3 + $0x1f8] sm:$0xff] }
  0x11   :  { %v393_v35 = vld [vmem:[%s1030_s3 + $0x168] sm:$0xff] }
  0x13   :  { %88 = vadd.xlane.f32.xlu0 %v87_v38  ;;  %93 = vadd.xlane.f32.xlu1 %v92_v39  ;;  %v369_v39 = vld [vmem:[%s1030_s3 + $0xa8] sm:$0xff] }
  0x14   :  { %v653_v46 = vpack.c.bf16 %v369_v39, %v368_v37  ;;  %v378_v37 = vld [vmem:[%s1030_s3 + $0xf0] sm:$0xff] }
  0x15   :  { %v410_v39 = vld [vmem:[%s1030_s3 + $0x1f0] sm:$0xff] }
  0x94   :  { %v59_v54 = vpop.xlane.xlu0 %58  ;;  %v69_v55 = vpop.xlane.xlu1 %68 }
  0x95   :  { %v95_v57 = vmul.f32 0.00390625, %v59_v54  ;;  %v97_v58 = vmul.f32 0.00390625, %v69_v55  ;;  %v403_v54 = vld [vmem:[%s1030_s3 + $0x1b8] sm:$0xff]  ;;  %v655_v55 = vpack.c.bf16 %v353_v45, %v352_v44  ;;  %v705_v44 = vpack.c.bf16 %v411_v41, %v410_v39 }
  0x97   :  { %v140_v63 = vrot.slane %v95_v57, %v139_v56  ;;  %v148_v2 = vrot.slane %v97_v58, %v139_v56  ;;  %v354_v57 = vld [vmem:[%s1030_s3 + $0x30] sm:$0xff]  ;;  %v355_v58 = vld [vmem:[%s1030_s3 + $0x38] sm:$0xff] }
  0x98   :  { %v64_v59 = vpop.xlane.xlu0 %63  ;;  %v74_v60 = vpop.xlane.xlu1 %73 }
  0x99   :  { %v96_v61 = vmul.f32 0.00390625, %v64_v59  ;;  %v98_v62 = vmul.f32 0.00390625, %v74_v60  ;;  %v657_v59 = vpack.c.bf16 %v371_v51, %v370_v50  ;;  %v689_v60 = vpack.c.bf16 %v403_v54, %v402_v53  ;;  %v105_v51 = vld [vmem:[%s1031_s2] sm:$0xf] }
  0x9a   :  { %v117_v50 = vsub.s32 2, %v818_v52  ;;  %v113_v53 = vsub.s32 1, %v818_v52  ;;  %v121_v54 = vsub.s32 3, %v818_v52 }
  0x9b   :  { %v144_v0 = vrot.slane %v96_v61, %v139_v56  ;;  %v152_v1 = vrot.slane %v98_v62, %v139_v56  ;;  %v386_v61 = vld [vmem:[%s1030_s3 + $0x130] sm:$0xff]  ;;  %v387_v62 = vld [vmem:[%s1030_s3 + $0x138] sm:$0xff] }
  0x9c   :  { %v79_v3 = vpop.xlane.xlu0 %78  ;;  %v84_v4 = vpop.xlane.xlu1 %83 }
  0x9d   :  { %v170_v5 = vsel %vm169_vm1, %v144_v0, %v140_v63  ;;  %v99_v6 = vmul.f32 0.00390625, %v79_v3  ;;  %v100_v7 = vmul.f32 0.00390625, %v84_v4  ;;  %v372_v63 = vld [vmem:[%s1030_s3 + $0xc0] sm:$0xff]  ;;  %v373_v0 = vld [vmem:[%s1030_s3 + $0xc8] sm:$0xff]  ;;  %v659_v3 = vpack.c.bf16 %v355_v58, %v354_v57 }
  0x9e   :  { %v172_v8 = vsel %vm171_vm2, %v148_v2, %v170_v5  ;;  %v405_v2 = vld [vmem:[%s1030_s3 + $0x1c8] sm:$0xff]  ;;  %v691_v4 = vpack.c.bf16 %v387_v62, %v386_v61  ;;  %v356_v5 = vld [vmem:[%s1030_s3 + $0x40] sm:$0xff]  ;;  %v114_v57 = vrot.slane %v105_v51, %v113_v53  ;;  %v122_v58 = vrot.slane %v105_v51, %v121_v54 }
  0x9f   :  { %v174_v9 = vsel %vm173_vm3, %v152_v1, %v172_v8  ;;  %v156_v10 = vrot.slane %v99_v6, %v139_v56  ;;  %v160_v11 = vrot.slane %v100_v7, %v139_v56  ;;  %v404_v1 = vld [vmem:[%s1030_s3 + $0x1c0] sm:$0xff]  ;;  %v357_v6 = vld [vmem:[%s1030_s3 + $0x48] sm:$0xff]  ;;  %v661_v7 = vpack.c.bf16 %v373_v0, %v372_v63 }
  0xa0   :  { %v89_v12 = vpop.xlane.xlu0 %88  ;;  %v94_v13 = vpop.xlane.xlu1 %93  ;;  %v693_v8 = vpack.c.bf16 %v405_v2, %v404_v1  ;;  %v663_v15 = vpack.c.bf16 %v357_v6, %v356_v5 }
  0xa1   :  { %v176_v16 = vsel %vm175_vm4, %v156_v10, %v174_v9  ;;  %v101_v17 = vmul.f32 0.00390625, %v89_v12  ;;  %v102_v18 = vmul.f32 0.00390625, %v94_v13  ;;  %v388_v9 = vld [vmem:[%s1030_s3 + $0x140] sm:$0xff]  ;;  %v389_v10 = vld [vmem:[%s1030_s3 + $0x148] sm:$0xff]  ;;  %v375_v12 = vld [vmem:[%s1030_s3 + $0xd8] sm:$0xff] }
  0xa2   :  { %v178_v27 = vsel %vm177_vm5, %v160_v11, %v176_v16  ;;  %v374_v11 = vld [vmem:[%s1030_s3 + $0xd0] sm:$0xff]  ;;  %v695_v16 = vpack.c.bf16 %v389_v10, %v388_v9 }
  0xa3   :  { %v164_v25 = vrot.slane %v101_v17, %v139_v56  ;;  %v168_v26 = vrot.slane %v102_v18, %v139_v56  ;;  %v687_v56 = vpack.c.bf16 %v385_v49, %v384_v48  ;;  %v406_v13 = vld [vmem:[%s1030_s3 + $0x1d0] sm:$0xff]  ;;  %v359_v18 = vld [vmem:[%s1030_s3 + $0x58] sm:$0xff]  ;;  %v665_v19 = vpack.c.bf16 %v375_v12, %v374_v11 }
  0xa4   :  { %v358_v17 = vld [vmem:[%s1030_s3 + $0x50] sm:$0xff]  ;;  %v697_v20 = vpack.c.bf16 %v407_v14, %v406_v13  ;;  %v109_v49 = vsub.s32 0, %v818_v52 }
  0xa5   :  { %v180_v32 = vsel %vm179_vm6, %v164_v25, %v178_v27  ;;  %v408_v25 = vld [vmem:[%s1030_s3 + $0x1e0] sm:$0xff]  ;;  %v667_v27 = vpack.c.bf16 %v359_v18, %v358_v17 }
  0xa6   :  { %v182_v38 = vsel %vm181_vm7, %v168_v26, %v180_v32  ;;  %v409_v26 = vld [vmem:[%s1030_s3 + $0x1e8] sm:$0xff] }
  0xa7   :  { %570 = vmatmul.mubr.msk.f32.vlgmr.msra.gmra.mrb[0].mxu0 %vm187_vm8, %v182_v38  ;;  %573 = vmatmul.mubr.msk.f32.vlgmr.msra.gmra.mrb[0].mxu1 %vm187_vm8, %v182_v38  ;;  %v701_v30 = vpack.c.bf16 %v409_v26, %v408_v25  ;;  %v361_v32 = vld [vmem:[%s1030_s3 + $0x68] sm:$0xff]  ;;  %v379_v38 = vld [vmem:[%s1030_s3 + $0xf8] sm:$0xff] }
  0xa8   :  { %648 = vmatpush3.bf16.msra.mxu0 %v647_v28  ;;  %680 = vmatpush3.bf16.msra.mxu1 %v679_v29  ;;  %v699_v28 = vpack.c.bf16 %v391_v22, %v390_v21  ;;  %v669_v29 = vpack.c.bf16 %v377_v24, %v376_v23  ;;  %v673_v40 = vpack.c.bf16 %v379_v38, %v378_v37 }
  0xa9   :  { %650 = vmatprep.subr.bf16.mxu0 %v649_v33  ;;  %682 = vmatprep.subr.bf16.mxu1 %v681_v34  ;;  %v392_v33 = vld [vmem:[%s1030_s3 + $0x160] sm:$0xff]  ;;  %v671_v34 = vpack.c.bf16 %v361_v32, %v360_v31 }
  0xaa   :  { %v703_v36 = vpack.c.bf16 %v393_v35, %v392_v33 }
  0xac   :  { %652 = vmatpush3.bf16.msra.mxu0 %v651_v42  ;;  %684 = vmatpush3.bf16.msra.mxu1 %v683_v43  ;;  %v362_v42 = vld [vmem:[%s1030_s3 + $0x70] sm:$0xff]  ;;  %v363_v43 = vld [vmem:[%s1030_s3 + $0x78] sm:$0xff] }
  0xad   :  { %654 = vmatprep.subr.bf16.mxu0 %v653_v46  ;;  %686 = vmatprep.subr.bf16.mxu1 %v685_v47  ;;  %v675_v45 = vpack.c.bf16 %v363_v43, %v362_v42  ;;  %v394_v46 = vld [vmem:[%s1030_s3 + $0x170] sm:$0xff]  ;;  %v395_v47 = vld [vmem:[%s1030_s3 + $0x178] sm:$0xff] }
  0xae   :  { %v707_v48 = vpack.c.bf16 %v395_v47, %v394_v46 }
  0xb0   :  { %656 = vmatpush3.bf16.msra.mxu0 %v655_v55  ;;  %688 = vmatpush3.bf16.msra.mxu1 %v687_v56  ;;  %v110_v55 = vrot.slane %v105_v51, %v109_v49  ;;  %v118_v56 = vrot.slane %v105_v51, %v117_v50 }
  0xb1   :  { %658 = vmatprep.subr.bf16.mxu0 %v657_v59  ;;  %690 = vmatprep.subr.bf16.mxu1 %v689_v60 }
  0xb4   :  { %660 = vmatpush3.bf16.msra.mxu0 %v659_v3  ;;  %692 = vmatpush3.bf16.msra.mxu1 %v691_v4 }
  0xb5   :  { %662 = vmatprep.subr.bf16.mxu0 %v661_v7  ;;  %694 = vmatprep.subr.bf16.mxu1 %v693_v8  ;;  %v574_v8 = vld [vmem:[%s1033_s4] ss:$0 sm:$0xff] }
  0xb8   :  { %664 = vmatpush3.bf16.msra.mxu0 %v663_v15  ;;  %696 = vmatpush3.bf16.msra.mxu1 %v695_v16 }
  0xb9   :  { %666 = vmatprep.subr.bf16.mxu0 %v665_v19  ;;  %698 = vmatprep.subr.bf16.mxu1 %v697_v20 }
  0xbc   :  { %668 = vmatpush3.bf16.msra.mxu0 %v667_v27  ;;  %700 = vmatpush3.bf16.msra.mxu1 %v699_v28 }
  0xbd   :  { %670 = vmatprep.subr.bf16.mxu0 %v669_v29  ;;  %702 = vmatprep.subr.bf16.mxu1 %v701_v30 }
  0xc0   :  { %672 = vmatpush3.bf16.msra.mxu0 %v671_v34  ;;  %704 = vmatpush3.bf16.msra.mxu1 %v703_v36 }
  0xc1   :  { %674 = vmatprep.subr.bf16.mxu0 %v673_v40  ;;  %706 = vmatprep.subr.bf16.mxu1 %v705_v44 }
  0xc4   :  { %676 = vmatpush3.bf16.msra.mxu0 %v675_v45  ;;  %708 = vmatpush3.bf16.msra.mxu1 %v707_v48 }
 0x17a   :  { %v264_v59 = vpop.f32.mrb[0].mxu0  ;;  %v335_v60 = vpop.f32.mrb[0].mxu1 }
 0x17b   :  { %v265_v61 = vadd.f32 %v264_v59, %v110_v55  ;;  %v336_v62 = vadd.f32 %v335_v60, %v118_v56  ;;  %v266_v63 = vpop.f32.mrb[1].mxu0  ;;  %v337_v0 = vpop.f32.mrb[1].mxu1 }
 0x17c   :  { %v267_v1 = vadd.f32 %v266_v63, %v114_v57  ;;  %v338_v2 = vadd.f32 %v337_v0, %v122_v58 }
 0x17d   :  { %v340_v3 = vmax.f32 %v265_v61, 0.0  ;;  %v342_v4 = vmax.f32 %v336_v62, 0.0 }
 0x17e   :  { %v341_v5 = vmax.f32 %v267_v1, 0.0  ;;  %v343_v6 = vmax.f32 %v338_v2, 0.0 }
 0x17f   :  { %344 = vst [vmem:[%s1032_s6] sm:$0xff] %v340_v3  ;;  %346 = vst [vmem:[%s1032_s6 + $0x10] sm:$0xff] %v342_v4 }
 0x180   :  { %345 = vst [vmem:[%s1032_s6 + $0x8] sm:$0xff] %v341_v5  ;;  %347 = vst [vmem:[%s1032_s6 + $0x18] sm:$0xff] %v343_v6  ;;  %483 = vmatprep.mubr.f32.mxu0 %v341_v5  ;;  %553 = vmatprep.mubr.f32.mxu1 %v343_v6 }
 0x181   :  { %484 = vmatmul.mubr.f32.vlgmr.msra.gmra.mrb[2].mxu0 %v340_v3  ;;  %554 = vmatmul.mubr.f32.vlgmr.msra.gmra.mrb[2].mxu1 %v342_v4 }
 0x254   :  { %v607_v52 = vpop.f32.mrb[2].mxu0  ;;  %v642_v7 = vpop.f32.mrb[2].mxu1 }
 0x255   :  { %v608_v9 = vpop.f32.mrb[3].mxu0  ;;  %v643_v10 = vpop.f32.mrb[3].mxu1 }
 0x256   :  { %v609_v11 = vadd.f32 %v608_v9, %v607_v52  ;;  %v644_v12 = vadd.f32 %v643_v10, %v642_v7 }
 0x258   :  { %v486_v13 = vadd.f32 %v609_v11, %v574_v8 }
 0x25a   :  { %v556_v14 = vadd.f32 %v644_v12, %v486_v13 }
 0x25c   :  { %559 = vst [vmem:[%s1034_s5] sm:$0xff] %v556_v14 }

</bundles_post_ra>
